<compile_context>
chip_gen: v7x
topology: tpu7x:2x2x1
jax: 0.10.0
libtpu: 0.0.40
codegen_flags: <defaults>
</compile_context>

<pallas_src>
import functools

import jax
import jax.numpy as jnp
from jax.experimental import pallas as pl
from jax.experimental.pallas import tpu as pltpu


def _round_up(x, m):
    return (x + m - 1) // m * m


def _nce_softmax_loss_kernel(sim_ref, o_ref, *, n_rows, batch, block_rows):
    pid = pl.program_id(0)

    @pl.when(pid == 0)
    def _init():
        o_ref[...] = jnp.zeros_like(o_ref)

    sim = sim_ref[...].astype(jnp.float32)                  # (TM, C), f32 math
    tm, c = sim.shape

    # Global row ids of this tile and their labels: (row + B) mod N, computed
    # with a compare + subtract on a (TM, 1) column instead of a full-width mod.
    local_row = jax.lax.broadcasted_iota(jnp.int32, (tm, 1), 0)
    grow = pid * block_rows + local_row                     # (TM, 1)
    lbl = grow + batch
    lbl = jnp.where(lbl >= n_rows, lbl - n_rows, lbl)       # (TM, 1)

    # One-hot pick of the label logit via a (1, C) class iota broadcast.
    col = jax.lax.broadcasted_iota(jnp.int32, (1, c), 1)    # (1, C)
    onehot = col == lbl                                     # (TM, C) bool

    # Numerically stable logsumexp per row.
    m = jnp.max(sim, axis=-1, keepdims=True)                               # (TM, 1)
    lse = m + jnp.log(jnp.sum(jnp.exp(sim - m), axis=-1, keepdims=True))   # (TM, 1)
    picked = jnp.sum(jnp.where(onehot, sim, 0.0), axis=-1, keepdims=True)  # (TM, 1)

    # Mask rows past the true N (last tile may be padded) and accumulate into
    # the resident (1, 1) output block.
    row_loss = jnp.where(grow < n_rows, lse - picked, 0.0)  # (TM, 1)
    o_ref[...] += jnp.sum(row_loss, keepdims=True)          # (1, 1)

    @pl.when(pid == pl.num_programs(0) - 1)
    def _finalize():
        o_ref[...] = o_ref[...] / jnp.float32(n_rows)


def nce_softmax_loss(similarity: jax.Array, *, block_bytes: int = 4 * 1024 * 1024) -> jax.Array:
    """Pallas implementation of NCESoftmaxLoss.forward(similarity).

    Pass a bfloat16 `similarity` to halve HBM traffic (math is f32 inside).
    `block_bytes` bounds the per-tile VMEM footprint (tune upward on v6e).
    """
    n, c = similarity.shape
    b = n // 2
    itemsize = jnp.dtype(similarity.dtype).itemsize

    # Rows per tile: fill ~block_bytes, multiple of 8 sublanes, >= 8, and no
    # larger than the (sublane-padded) row count.
    tm = max(8, (block_bytes // (c * itemsize)) // 8 * 8)
    tm = min(tm, _round_up(n, 8))
    grid = (pl.cdiv(n, tm),)

    kernel = functools.partial(
        _nce_softmax_loss_kernel, n_rows=n, batch=b, block_rows=tm)

    out = pl.pallas_call(
        kernel,
        out_shape=jax.ShapeDtypeStruct((1, 1), jnp.float32),
        grid=grid,
        in_specs=[pl.BlockSpec((tm, c), lambda i: (i, 0))],
        out_specs=pl.BlockSpec((1, 1), lambda i: (0, 0)),
        compiler_params=pltpu.CompilerParams(
            dimension_semantics=("arbitrary",),   # serial accumulation in o_ref
            vmem_limit_bytes=32 * 1024 * 1024,
        ),
    )(similarity)
    return out[0, 0]


def _reference_loss(similarity: jax.Array) -> jax.Array:
    # Pure-JAX reference (mirrors torch.nn.CrossEntropyLoss, mean reduction).
    n = similarity.shape[0]
    b = n // 2
    labels = (jnp.arange(n) + b) % n
    logp = jax.nn.log_softmax(similarity.astype(jnp.float32), axis=-1)
    return -jnp.mean(logp[jnp.arange(n), labels])


if __name__ == "__main__":
    key0, key1 = jax.random.split(jax.random.PRNGKey(0))

    # Case 1: spec-sized toy input (B=8 -> 16x16), f32, single tile.
    B = 8
    sim = jax.random.normal(key0, (2 * B, 2 * B), dtype=jnp.float32)
    loss = jax.block_until_ready(nce_softmax_loss(sim))
    ref = jax.block_until_ready(_reference_loss(sim))
    assert jnp.allclose(loss, ref, atol=1e-5, rtol=1e-4), (loss, ref)

    # Case 2: force the multi-tile path (8-row tiles -> 2 grid steps) plus
    # padded-row masking (N=12 is not a multiple of the tile height).
    B2 = 6
    sim2 = jax.random.normal(key1, (2 * B2, 2 * B2), dtype=jnp.float32)
    loss2 = jax.block_until_ready(nce_softmax_loss(sim2, block_bytes=1))
    ref2 = jax.block_until_ready(_reference_loss(sim2))
    assert jnp.allclose(loss2, ref2, atol=1e-5, rtol=1e-4), (loss2, ref2)

    # Case 3: bfloat16 input (half the HBM traffic); compare against the same
    # bf16-rounded logits run through the f32 reference.
    sim_bf16 = sim.astype(jnp.bfloat16)
    loss3 = jax.block_until_ready(nce_softmax_loss(sim_bf16))
    ref3 = jax.block_until_ready(_reference_loss(sim_bf16))
    assert jnp.allclose(loss3, ref3, atol=1e-5, rtol=1e-4), (loss3, ref3)

    print("KERNEL_OK")
</pallas_src>

<mosaic_0001>
module attributes {stable_mosaic.version = 11 : i64} {
  func.func @_nce_softmax_loss_kernel(%arg0: i32, %arg1: memref<16x16xf32, #tpu.memory_space<vmem>>, %arg2: memref<1x1xf32, #tpu.memory_space<vmem>>) attributes {dimension_semantics = [#tpu.dimension_semantics<arbitrary>], iteration_bounds = array<i64: 1>, scalar_prefetch = 0 : i64, scratch_operands = 0 : i64, tpu.core_type = #tpu.core_type<tc>, window_params = [{transform_indices = @transform_0, window_bounds = array<i64: 16, 16>}, {pipeline_mode = #tpu.pipeline_mode<synchronous>, transform_indices = @transform_1, window_bounds = array<i64: 1, 1>}]} {
    %c0_i32 = arith.constant 0 : i32
    %0 = arith.cmpi eq, %arg0, %c0_i32 : i32
    %1 = arith.extui %0 : i1 to i32
    %c0_i32_0 = arith.constant 0 : i32
    %2 = arith.cmpi ne, %1, %c0_i32_0 : i32
    scf.if %2 {
      %cst_16 = arith.constant 0.000000e+00 : f32
      %48 = vector.broadcast %cst_16 : f32 to vector<1x1xf32>
      %c0_17 = arith.constant 0 : index
      %c0_18 = arith.constant 0 : index
      %49 = vector.load %arg2[%c0_17, %c0_18] : memref<1x1xf32, #tpu.memory_space<vmem>>, vector<1x1xf32>
      tpu.vector_store %arg2[%c0_17, %c0_18], %48 {strides = array<i32>} : memref<1x1xf32, #tpu.memory_space<vmem>>, vector<1x1xf32>,
    } else {
    }
    %c0 = arith.constant 0 : index
    %c0_1 = arith.constant 0 : index
    %3 = vector.load %arg1[%c0, %c0_1] : memref<16x16xf32, #tpu.memory_space<vmem>>, vector<16x16xf32>
    %4 = tpu.iota {dimensions = array<i32: 0>} : vector<16x1xi32>
    %c16_i32 = arith.constant 16 : i32
    %5 = arith.muli %arg0, %c16_i32 : i32
    %6 = vector.broadcast %5 : i32 to vector<16x1xi32>
    %7 = arith.addi %6, %4 : vector<16x1xi32>
    %c8_i32 = arith.constant 8 : i32
    %8 = vector.broadcast %c8_i32 : i32 to vector<16x1xi32>
    %9 = arith.addi %7, %8 : vector<16x1xi32>
    %c16_i32_2 = arith.constant 16 : i32
    %10 = vector.broadcast %c16_i32_2 : i32 to vector<16x1xi32>
    %11 = arith.cmpi sge, %9, %10 : vector<16x1xi32>
    %c16_i32_3 = arith.constant 16 : i32
    %12 = vector.broadcast %c16_i32_3 : i32 to vector<16x1xi32>
    %13 = arith.subi %9, %12 : vector<16x1xi32>
    %14 = arith.select %11, %13, %9 : vector<16x1xi1>, vector<16x1xi32>
    %15 = tpu.iota {dimensions = array<i32: 1>} : vector<1x16xi32>
    %16 = vector.broadcast %15 : vector<1x16xi32> to vector<16x16xi32>
    %17 = vector.broadcast %14 : vector<16x1xi32> to vector<16x16xi32>
    %18 = arith.cmpi eq, %16, %17 : vector<16x16xi32>
    %cst = arith.constant dense<0xFF800000> : vector<16xf32>
    %19 = vector.multi_reduction <maximumf>, %3, %cst [1] : vector<16x16xf32> to vector<16xf32>
    %20 = vector.shape_cast %19 : vector<16xf32> to vector<16x1xf32>
    %21 = vector.broadcast %20 : vector<16x1xf32> to vector<16x16xf32>
    %22 = arith.subf %3, %21 : vector<16x16xf32>
    %23 = math.exp %22 : vector<16x16xf32>
    %cst_4 = arith.constant dense<0.000000e+00> : vector<16xf32>
    %24 = vector.multi_reduction <add>, %23, %cst_4 [1] : vector<16x16xf32> to vector<16xf32>
    %25 = vector.shape_cast %24 : vector<16xf32> to vector<16x1xf32>
    %26 = math.log %25 : vector<16x1xf32>
    %27 = arith.addf %20, %26 : vector<16x1xf32>
    %cst_5 = arith.constant 0.000000e+00 : f32
    %28 = vector.broadcast %cst_5 : f32 to vector<16x16xf32>
    %29 = arith.select %18, %3, %28 : vector<16x16xi1>, vector<16x16xf32>
    %cst_6 = arith.constant dense<0.000000e+00> : vector<16xf32>
    %30 = vector.multi_reduction <add>, %29, %cst_6 [1] : vector<16x16xf32> to vector<16xf32>
    %31 = vector.shape_cast %30 : vector<16xf32> to vector<16x1xf32>
    %c16_i32_7 = arith.constant 16 : i32
    %32 = vector.broadcast %c16_i32_7 : i32 to vector<16x1xi32>
    %33 = arith.cmpi slt, %7, %32 : vector<16x1xi32>
    %34 = arith.subf %27, %31 : vector<16x1xf32>
    %cst_8 = arith.constant 0.000000e+00 : f32
    %35 = vector.broadcast %cst_8 : f32 to vector<16x1xf32>
    %36 = arith.select %33, %34, %35 : vector<16x1xi1>, vector<16x1xf32>
    %c0_9 = arith.constant 0 : index
    %c0_10 = arith.constant 0 : index
    %37 = vector.load %arg2[%c0_9, %c0_10] : memref<1x1xf32, #tpu.memory_space<vmem>>, vector<1x1xf32>
    %38 = vector.shape_cast %36 : vector<16x1xf32> to vector<1x16x1xf32>
    %cst_11 = arith.constant dense<0.000000e+00> : vector<1xf32>
    %39 = vector.multi_reduction <add>, %38, %cst_11 [1, 2] : vector<1x16x1xf32> to vector<1xf32>
    %40 = vector.shape_cast %39 : vector<1xf32> to vector<1x1x1xf32>
    %41 = vector.extract %40[0, 0, 0] : f32 from vector<1x1x1xf32>
    %42 = vector.broadcast %41 : f32 to vector<1x1xf32>
    %43 = arith.addf %37, %42 : vector<1x1xf32>
    %c0_12 = arith.constant 0 : index
    %c0_13 = arith.constant 0 : index
    %44 = vector.load %arg2[%c0_12, %c0_13] : memref<1x1xf32, #tpu.memory_space<vmem>>, vector<1x1xf32>
    tpu.vector_store %arg2[%c0_12, %c0_13], %43 {strides = array<i32>} : memref<1x1xf32, #tpu.memory_space<vmem>>, vector<1x1xf32>,
    %c0_i32_14 = arith.constant 0 : i32
    %45 = arith.cmpi eq, %arg0, %c0_i32_14 : i32
    %46 = arith.extui %45 : i1 to i32
    %c0_i32_15 = arith.constant 0 : i32
    %47 = arith.cmpi ne, %46, %c0_i32_15 : i32
    scf.if %47 {
      %c0_16 = arith.constant 0 : index
      %c0_17 = arith.constant 0 : index
      %48 = vector.load %arg2[%c0_16, %c0_17] : memref<1x1xf32, #tpu.memory_space<vmem>>, vector<1x1xf32>
      %cst_18 = arith.constant 1.600000e+01 : f32
      %49 = vector.broadcast %cst_18 : f32 to vector<1x1xf32>
      %50 = arith.divf %48, %49 : vector<1x1xf32>
      %c0_19 = arith.constant 0 : index
      %c0_20 = arith.constant 0 : index
      %51 = vector.load %arg2[%c0_19, %c0_20] : memref<1x1xf32, #tpu.memory_space<vmem>>, vector<1x1xf32>
      tpu.vector_store %arg2[%c0_19, %c0_20], %50 {strides = array<i32>} : memref<1x1xf32, #tpu.memory_space<vmem>>, vector<1x1xf32>,
    } else {
    }
    return
  }
  func.func @transform_0(%arg0: i32) -> (i32, i32) {
    %c0_i32 = arith.constant 0 : i32
    %c0_i32_0 = arith.constant 0 : i32
    return %arg0, %c0_i32 : i32, i32
  }
  func.func @transform_1(%arg0: i32) -> (i32, i32) {
    %c0_i32 = arith.constant 0 : i32
    %c0_i32_0 = arith.constant 0 : i32
    %c0_i32_1 = arith.constant 0 : i32
    return %c0_i32, %c0_i32_0 : i32, i32
  }
}

</mosaic_0001>

<bundles_post_ra>
// kernel: tpu_custom_call.1
= control target key start
LH: loop header
LB: loop body
LE: loop exit
PB: predicated region body
PF: predicated region fallthrough
CT: control target
= control target key end

     0   :  { %6 = vsyncpa [#allocation3], 0  ;;  %s242_s0 = inlined_call_operand.hbm [shape: f32[16,16], index: 0, kind: input, shape index: {}]   ;;  %s243_s1 = inlined_call_operand.hbm [shape: f32[1,1], index: 1, kind: output, shape index: {}]  }
   0x1   :  { %7 = vsyncpa [#allocation4], 0  ;;  %s194_s6 = smov [#allocation2]   ;;  %s146_s10 = scalar_lea.hbm %s242_s0, 256 }
   0x2   :  { %s13_s7 = sshll.u32 %s194_s6, 4  ;;  %p147_p0 = scmp.ne.s32.totalorder %s242_s0, %s146_s10  ;;  %s14_s7 = int_to_ptr.vmem [resolvable:$true] %s13_s7 }
   0x3   :  { %p150_p1 = scmp.lt.u32.totalorder %s146_s10, %s242_s0 }
   0x5   :  { %p152_p2 = pnand %p150_p1, %p147_p0 }
   0x7   :  { %155 = shalt.err (!%p152_p2)
}
   0x8   :  { %s156_s15 = scalar_lea.vmem %s14_s7, 256  ;;  %p161_p4 = scmp.lt.s32.totalorder %s14_s7, %s14_s7 }
   0x9   :  { %p157_p3 = scmp.ne.s32.totalorder %s14_s7, %s156_s15  ;;  %p162_p5 = scmp.lt.s32.totalorder %s156_s15, %s156_s15 }
   0xb   :  { %p163_p6 = por %p162_p5, %p161_p4 }
   0xd   :  { %p164_p7 = pnand %p163_p6, %p157_p3 }
   0xf   :  { %167 = shalt.err (!%p164_p7)
}
  0x10   :  { %s195_s16 = smov 128   ;;  %s196_s17 = smov 8  }
  0x11   :  { %19 = dma.hbm_to_vmem [thread:$0]  %s242_s0, 256, %s14_s7, [#allocation3], %s195_s16, %s195_s16, %s196_s17  }
  0x12   :  { %190 = dma.done.wait [#allocation3], 256  }
  0x13   :  { %191 = vsyncadd [#allocation3], 4294967040  ;;  %vm50_vm0 = vcmask 130048   ;;  %v29_v0 = vld [vmem:[#allocation2] sm:$0xff]  ;;  %v30_v1 = vld [vmem:[#allocation2 + $0x8] sm:$0xff]  ;;  %v31_v4 = vlaneseq  ;;  %vm90_vm3 = vcmask 7168  }
  0x14   :  { %v51_v2 = vsel %vm50_vm0, %v29_v0, -inf  ;;  %v54_v3 = vsel %vm50_vm0, %v30_v1, -inf  ;;  %vm27_vm4 = vcmask 0   ;;  %v197_v39 = vmov 0.0   ;;  %s198_s20 = smov [#allocation5]  }
  0x15   :  { %52 = vmax.xlane.f32.xlu0 %v51_v2  ;;  %v32_v5 = vshrl.u32 %v31_v4, 7  ;;  %v47_v6 = vand.u32 127, %v31_v4  ;;  %28 = vst.msk [vmem:[#allocation5] sm:$0x1] %vm27_vm4, %v197_v39  ;;  %s120_s21 = sshll.u32 %s198_s20, 4  ;;  %s121_s21 = int_to_ptr.vmem [resolvable:$true] %s120_s21 }
  0x16   :  { %s168_s22 = scalar_lea.vmem %s121_s21, 16  ;;  %s172_s23 = scalar_lea.vmem %s121_s21, 32 }
  0x17   :  { %v33_v7 = vadd.s32 8, %v32_v5  ;;  %p169_p8 = scmp.ne.s32.totalorder %s121_s21, %s168_s22  ;;  %p173_p9 = scmp.lt.s32.totalorder %s121_s21, %s121_s21 }
  0x18   :  { %p174_p10 = scmp.lt.s32.totalorder %s172_s23, %s168_s22 }
  0x19   :  { %55 = vmax.xlane.f32.xlu0 %v54_v3  ;;  %vm48_vm1 = vcmp.eq.s32.totalorder %v47_v6, %v33_v7  ;;  %v39_v8 = vadd.s32 8, %v33_v7 }
  0x1a   :  { %v75_v9 = vsel %vm48_vm1, %v29_v0, 0.0  ;;  %p175_p11 = por %p174_p10, %p173_p9 }
  0x1b   :  { %v77_v10 = vsel %vm50_vm0, %v75_v9, 0.0  ;;  %v130_v11 = vadd.s32 4294967280, %v39_v8 }
  0x1c   :  { %v89_v47 = vld [vmem:[#allocation5] sm:$0x1]  ;;  %p176_p12 = pnand %p175_p11, %p169_p8 }
  0x1d   :  { %78 = vadd.xlane.f32.xlu0 %v77_v10  ;;  %vm49_vm2 = vcmp.eq.s32.totalorder %v47_v6, %v130_v11 }
  0x1e   :  { %v76_v21 = vsel %vm49_vm2, %v30_v1, 0.0 }
  0x1f   :  { %v80_v23 = vsel %vm50_vm0, %v76_v21, 0.0 }
  0xa2   :  { %v53_v12 = vpop.xlane.xlu0 %52 }
  0xa3   :  { %v57_v13 = vsub.f32 %v29_v0, %v53_v12 }
  0xa5   :  { %v59_v14 = vmul.f32 1.442695, %v57_v13 }
  0xa6   :  { %v56_v15 = vpop.xlane.xlu0 %55 }
  0xa7   :  { %138 = vpow2.f32 %v59_v14  ;;  %v58_v16 = vsub.f32 %v30_v1, %v56_v15 }
  0xa9   :  { %v61_v17 = vmul.f32 1.442695, %v58_v16 }
  0xaa   :  { %v79_v30 = vpop.xlane.xlu0 %78 }
  0xab   :  { %140 = vpow2.f32 %v61_v17 }
  0xb1   :  { %v139_v18 = vpop.eup %138 }
  0xb2   :  { %v63_v19 = vsel %vm50_vm0, %v139_v18, 0.0 }
  0xb3   :  { %64 = vadd.xlane.f32.xlu1 %v63_v19 }
  0xb5   :  { %v141_v20 = vpop.eup %140 }
  0xb6   :  { %v66_v22 = vsel %vm50_vm0, %v141_v20, 0.0 }
  0xb7   :  { %67 = vadd.xlane.f32.xlu1 %v66_v22 }
  0xbb   :  { %81 = vadd.xlane.f32.xlu1 %v80_v23 }
 0x140   :  { %v65_v24 = vpop.xlane.xlu1 %64 }
 0x141   :  { %142 = vlog2.f32 %v65_v24 }
 0x144   :  { %v68_v25 = vpop.xlane.xlu1 %67 }
 0x145   :  { %144 = vlog2.f32 %v68_v25 }
 0x148   :  { %v82_v32 = vpop.xlane.xlu1 %81 }
 0x14b   :  { %v143_v26 = vpop.eup %142 }
 0x14c   :  { %v70_v27 = vmul.f32 0.6931472, %v143_v26 }
 0x14e   :  { %v73_v28 = vadd.f32 %v70_v27, %v53_v12 }
 0x14f   :  { %v145_v29 = vpop.eup %144 }
 0x150   :  { %v72_v31 = vmul.f32 0.6931472, %v145_v29  ;;  %v85_v33 = vsub.f32 %v73_v28, %v79_v30 }
 0x152   :  { %v74_v34 = vadd.f32 %v72_v31, %v56_v15  ;;  %v91_v36 = vsel %vm90_vm3, %v85_v33, 0.0 }
 0x154   :  { %v86_v35 = vsub.f32 %v74_v34, %v82_v32 }
 0x156   :  { %v92_v37 = vsel %vm90_vm3, %v86_v35, 0.0 }
 0x157   :  { %v93_v38 = vadd.f32 %v92_v37, %v91_v36 }
 0x159   :  { %94 = vadd.xlane.f32.xlu0 %v93_v38 }
 0x1e6   :  { %v95_v40 = vpop.xlane.xlu0 %94 }
 0x1e7   :  { %v96_v41 = vrot.slane %v95_v40, 4 }
 0x1e9   :  { %v97_v42 = vadd.f32 %v96_v41, %v95_v40 }
 0x1eb   :  { %v98_v43 = vrot.slane %v97_v42, 2 }
 0x1ed   :  { %v99_v44 = vadd.f32 %v98_v43, %v97_v42 }
 0x1ef   :  { %v100_v45 = vrot.slane %v99_v44, 1 }
 0x1f1   :  { %v101_v46 = vadd.f32 %v100_v45, %v99_v44 }
 0x1f3   :  { %131 = vpush %v101_v46 }
 0x224   :  { %s132_s0 = spop %131 }
 0x225   :  { %v103_v48 = vstv %s132_s0 }
 0x226   :  { %v104_v49 = vadd.f32 %v103_v48, %v89_v47 }
 0x228   :  { %106 = vst.msk [vmem:[#allocation5] sm:$0x1] %vm27_vm4, %v104_v49 }
 0x22f   :  { %v110_v50 = vld [vmem:[#allocation5] sm:$0x1] }
 0x230   :  { %v112_v51 = vmul.f32 0.0625, %v110_v50 }
 0x232   :  { %113 = vst.msk [vmem:[#allocation5] sm:$0x1] %vm27_vm4, %v112_v51 }
 0x233   :  { %179 = shalt.err (!%p176_p12)
}
 0x234   :  { %s180_s26 = scalar_lea.hbm %s243_s1, 16 }
 0x235   :  { %p181_p13 = scmp.ne.s32.totalorder %s243_s1, %s180_s26  ;;  %p184_p0 = scmp.lt.u32.totalorder %s180_s26, %s243_s1 }
 0x237   :  { %p186_p1 = pnand %p184_p0, %p181_p13 }
 0x239   :  { %189 = shalt.err (!%p186_p1)
}
 0x23a   :  { %123 = dma.vmem_to_hbm [thread:$0]  %s121_s21, 16, %s243_s1, [#allocation4]  }
 0x23b   :  { %192 = dma.done.wait [#allocation4], 16  }
 0x23c   :  { %193 = vsyncadd [#allocation4], 4294967280 }
 0x23d   :  { %127 = vsyncpa [#allocation3], 1 }
 0x23e   :  { %128 = vsyncpa [#allocation4], 1 }

</bundles_post_ra>
